<compile_context>
chip_gen: v6e
topology: v6e:2x2x1
jax: 0.10.0
libtpu: 0.0.40
codegen_flags: <defaults>
</compile_context>

<pallas_src>
import functools

import jax
import jax.numpy as jnp
from jax.experimental import pallas as pl
from jax.experimental.pallas import tpu as pltpu


def _round_up(x, m):
    return ((x + m - 1) // m) * m


def ppo_actor_kernel(x_ref, w1_ref, b1_ref, w2_ref, b2_ref, wh_ref, bh_ref,
                     out_ref):
    # Trunk: Linear -> ReLU -> Linear -> ReLU. bf16 MXU operands, f32 accumulate.
    x = x_ref[...]                                                  # bf16 [TB, S]
    h1 = jnp.dot(x, w1_ref[...], preferred_element_type=jnp.float32) + b1_ref[...]
    h1 = jnp.maximum(h1, 0.0)
    h2 = jnp.dot(h1.astype(jnp.bfloat16), w2_ref[...],
                 preferred_element_type=jnp.float32) + b2_ref[...]
    h2 = jnp.maximum(h2, 0.0)

    # Fused heads: columns [0, A) are mean logits, [A, 2A) are log_std logits.
    heads = jnp.dot(h2.astype(jnp.bfloat16), wh_ref[...],
                    preferred_element_type=jnp.float32) + bh_ref[...]
    a = heads.shape[-1] // 2
    col = jax.lax.broadcasted_iota(jnp.int32, heads.shape, 1)
    # tanh/clip over all 2A=16 cols then select: EUP/VALU have slack at this
    # width, so the redundancy is free (flagged, not a bottleneck).
    out_ref[...] = jnp.where(col < a,
                             jnp.tanh(heads),
                             jnp.clip(heads, -20.0, 2.0))


def pack_params(params):
    """One-time parameter prep (do NOT call per forward step).

    Fuses the two heads into a single [H, 2A] weight / [1, 2A] bias and casts
    all matmul weights to bf16 (MXU operand dtype). Biases stay f32 (they are
    added to f32 accumulators).
    """
    w1, b1, w2, b2, wm, bm, ws, bs = params
    wh = jnp.concatenate([wm, ws], axis=1)
    bh = jnp.concatenate([bm, bs], axis=1)
    return (w1.astype(jnp.bfloat16), b1,
            w2.astype(jnp.bfloat16), b2,
            wh.astype(jnp.bfloat16), bh)


def ppo_actor_forward(x, packed_params, *, block_b=1024, num_cores=2):
    """x: [B, state_dim] f32. packed_params from pack_params().

    Returns (mean, log_std), each [B, action_dim] f32.
    """
    w1_bf, b1, w2_bf, b2, wh_bf, bh = packed_params
    B, S = x.shape
    H = w1_bf.shape[1]
    A2 = wh_bf.shape[1]
    A = A2 // 2

    x_bf = x.astype(jnp.bfloat16)

    # Batch tile: as large as possible (amortize per-grid-step overhead), but
    # no larger than needed to give >= num_cores grid steps so the "parallel"
    # axis shards across TensorCores on v7x. Multiple of 16 (bf16 sublane
    # packing). VMEM per step at TB=1024 is ~1.2 MB -> fits every generation.
    per_core = -(-B // max(1, num_cores))           # cdiv(B, num_cores)
    TB = min(block_b, max(16, _round_up(per_core, 16)))
    Bp = _round_up(B, TB)
    if Bp != B:
        x_bf = jnp.pad(x_bf, ((0, Bp - B), (0, 0)))
    grid = (Bp // TB,)

    const2 = lambda i: (0, 0)

    cost = pl.CostEstimate(
        flops=2 * Bp * (S * H + H * H + H * A2),
        transcendentals=Bp * A2,
        bytes_accessed=(x_bf.size * 2 + w1_bf.size * 2 + w2_bf.size * 2
                        + wh_bf.size * 2 + b1.size * 4 + b2.size * 4
                        + bh.size * 4 + Bp * A2 * 4),
    )

    fused = pl.pallas_call(
        ppo_actor_kernel,
        out_shape=jax.ShapeDtypeStruct((Bp, A2), jnp.float32),
        grid=grid,
        in_specs=[
            pl.BlockSpec((TB, S), lambda i: (i, 0)),   # x: tiled on batch (pipelined)
            pl.BlockSpec((S, H), const2),              # weights/biases VMEM-resident
            pl.BlockSpec((1, H), const2),
            pl.BlockSpec((H, H), const2),
            pl.BlockSpec((1, H), const2),
            pl.BlockSpec((H, A2), const2),
            pl.BlockSpec((1, A2), const2),
        ],
        out_specs=pl.BlockSpec((TB, A2), lambda i: (i, 0)),
        compiler_params=pltpu.CompilerParams(
            dimension_semantics=("parallel",),
        ),
        cost_estimate=cost,
    )(x_bf, w1_bf, b1, w2_bf, b2, wh_bf, bh)

    mean = fused[:B, :A]
    log_std = fused[:B, A:]
    return mean, log_std


def init_params(key, state_dim, hidden_dim, action_dim):
    """torch.nn.Linear-style init (uniform +/- 1/sqrt(fan_in)).
    Weights stored [in_features, out_features] (x @ W); biases [1, out_features].
    NOTE: torch stores [out, in] -- transpose when importing real checkpoints."""
    def linear(k, fan_in, fan_out):
        kw, kb = jax.random.split(k)
        bound = 1.0 / jnp.sqrt(fan_in)
        w = jax.random.uniform(kw, (fan_in, fan_out), jnp.float32, -bound, bound)
        b = jax.random.uniform(kb, (1, fan_out), jnp.float32, -bound, bound)
        return w, b

    k1, k2, k3, k4 = jax.random.split(key, 4)
    w1, b1 = linear(k1, state_dim, hidden_dim)
    w2, b2 = linear(k2, hidden_dim, hidden_dim)
    wm, bm = linear(k3, hidden_dim, action_dim)
    ws, bs = linear(k4, hidden_dim, action_dim)
    return (w1, b1, w2, b2, wm, bm, ws, bs)


def reference_forward(x, params):
    """Pure-JAX reference mirroring the kernel's bf16-operand / f32-accumulate path."""
    w1, b1, w2, b2, wm, bm, ws, bs = params

    def mm(a, w):
        return jnp.dot(a.astype(jnp.bfloat16), w.astype(jnp.bfloat16),
                       preferred_element_type=jnp.float32)

    h = jnp.maximum(mm(x, w1) + b1, 0.0)
    h = jnp.maximum(mm(h, w2) + b2, 0.0)
    mean = jnp.tanh(mm(h, wm) + bm)
    log_std = jnp.clip(mm(h, ws) + bs, -20.0, 2.0)
    return mean, log_std


if __name__ == "__main__":
    # Small, module-consistent shapes.
    batch = 8
    state_dim = 32
    hidden_dim = 256
    action_dim = 8

    key = jax.random.PRNGKey(0)
    kx, kp = jax.random.split(key)
    x = jax.random.normal(kx, (batch, state_dim), jnp.float32)
    params = init_params(kp, state_dim, hidden_dim, action_dim)

    # Pack once (head fusion + bf16 casts hoisted out of the forward path).
    packed = jax.tree_util.tree_map(jax.block_until_ready, pack_params(params))

    forward = jax.jit(functools.partial(ppo_actor_forward))
    mean, log_std = forward(x, packed)
    mean = jax.block_until_ready(mean)
    log_std = jax.block_until_ready(log_std)

    ref_mean, ref_log_std = reference_forward(x, params)
    assert mean.shape == (batch, action_dim)
    assert log_std.shape == (batch, action_dim)
    assert jnp.allclose(mean, ref_mean, atol=1e-2, rtol=1e-2), \
        f"mean mismatch: {jnp.max(jnp.abs(mean - ref_mean))}"
    assert jnp.allclose(log_std, ref_log_std, atol=1e-2, rtol=1e-2), \
        f"log_std mismatch: {jnp.max(jnp.abs(log_std - ref_log_std))}"

    print("KERNEL_OK")
</pallas_src>

<mosaic_0001>
module attributes {stable_mosaic.version = 11 : i64} {
  func.func @ppo_actor_kernel(%arg0: i32, %arg1: memref<16x32xbf16, #tpu.memory_space<vmem>>, %arg2: memref<32x256xbf16, #tpu.memory_space<vmem>>, %arg3: memref<1x256xf32, #tpu.memory_space<vmem>>, %arg4: memref<256x256xbf16, #tpu.memory_space<vmem>>, %arg5: memref<1x256xf32, #tpu.memory_space<vmem>>, %arg6: memref<256x16xbf16, #tpu.memory_space<vmem>>, %arg7: memref<1x16xf32, #tpu.memory_space<vmem>>, %arg8: memref<16x16xf32, #tpu.memory_space<vmem>>) attributes {dimension_semantics = [#tpu.dimension_semantics<parallel>], iteration_bounds = array<i64: 1>, scalar_prefetch = 0 : i64, scratch_operands = 0 : i64, tpu.core_type = #tpu.core_type<tc>, window_params = [{transform_indices = @transform_0, window_bounds = array<i64: 16, 32>}, {pipeline_mode = #tpu.pipeline_mode<synchronous>, transform_indices = @transform_1, window_bounds = array<i64: 32, 256>}, {pipeline_mode = #tpu.pipeline_mode<synchronous>, transform_indices = @transform_2, window_bounds = array<i64: 1, 256>}, {pipeline_mode = #tpu.pipeline_mode<synchronous>, transform_indices = @transform_3, window_bounds = array<i64: 256, 256>}, {pipeline_mode = #tpu.pipeline_mode<synchronous>, transform_indices = @transform_4, window_bounds = array<i64: 1, 256>}, {pipeline_mode = #tpu.pipeline_mode<synchronous>, transform_indices = @transform_5, window_bounds = array<i64: 256, 16>}, {pipeline_mode = #tpu.pipeline_mode<synchronous>, transform_indices = @transform_6, window_bounds = array<i64: 1, 16>}, {transform_indices = @transform_7, window_bounds = array<i64: 16, 16>}]} {
    %c0 = arith.constant 0 : index
    %c0_0 = arith.constant 0 : index
    %0 = vector.load %arg1[%c0, %c0_0] : memref<16x32xbf16, #tpu.memory_space<vmem>>, vector<16x32xbf16>
    %c0_1 = arith.constant 0 : index
    %c0_2 = arith.constant 0 : index
    %1 = vector.load %arg2[%c0_1, %c0_2] : memref<32x256xbf16, #tpu.memory_space<vmem>>, vector<32x256xbf16>
    %cst = arith.constant dense<0.000000e+00> : vector<16x256xf32>
    %2 = tpu.matmul %0, %1, %cst {dimension_numbers = #tpu.dot_dimension_numbers<[1], [0], [0], [1], [0, 0, 1, 1], [], []>} : vector<16x32xbf16>, vector<32x256xbf16>, vector<16x256xf32> -> vector<16x256xf32>
    %c0_3 = arith.constant 0 : index
    %c0_4 = arith.constant 0 : index
    %3 = vector.load %arg3[%c0_3, %c0_4] : memref<1x256xf32, #tpu.memory_space<vmem>>, vector<1x256xf32>
    %4 = vector.broadcast %3 : vector<1x256xf32> to vector<16x256xf32>
    %5 = arith.addf %2, %4 : vector<16x256xf32>
    %cst_5 = arith.constant 0.000000e+00 : f32
    %6 = vector.broadcast %cst_5 : f32 to vector<16x256xf32>
    %7 = arith.maximumf %5, %6 : vector<16x256xf32>
    %8 = arith.truncf %7 : vector<16x256xf32> to vector<16x256xbf16>
    %c0_6 = arith.constant 0 : index
    %c0_7 = arith.constant 0 : index
    %9 = vector.load %arg4[%c0_6, %c0_7] : memref<256x256xbf16, #tpu.memory_space<vmem>>, vector<256x256xbf16>
    %cst_8 = arith.constant dense<0.000000e+00> : vector<16x256xf32>
    %10 = tpu.matmul %8, %9, %cst_8 {dimension_numbers = #tpu.dot_dimension_numbers<[1], [0], [0], [1], [0, 0, 1, 1], [], []>} : vector<16x256xbf16>, vector<256x256xbf16>, vector<16x256xf32> -> vector<16x256xf32>
    %c0_9 = arith.constant 0 : index
    %c0_10 = arith.constant 0 : index
    %11 = vector.load %arg5[%c0_9, %c0_10] : memref<1x256xf32, #tpu.memory_space<vmem>>, vector<1x256xf32>
    %12 = vector.broadcast %11 : vector<1x256xf32> to vector<16x256xf32>
    %13 = arith.addf %10, %12 : vector<16x256xf32>
    %cst_11 = arith.constant 0.000000e+00 : f32
    %14 = vector.broadcast %cst_11 : f32 to vector<16x256xf32>
    %15 = arith.maximumf %13, %14 : vector<16x256xf32>
    %16 = arith.truncf %15 : vector<16x256xf32> to vector<16x256xbf16>
    %c0_12 = arith.constant 0 : index
    %c0_13 = arith.constant 0 : index
    %17 = vector.load %arg6[%c0_12, %c0_13] : memref<256x16xbf16, #tpu.memory_space<vmem>>, vector<256x16xbf16>
    %cst_14 = arith.constant dense<0.000000e+00> : vector<16x16xf32>
    %18 = tpu.matmul %16, %17, %cst_14 {dimension_numbers = #tpu.dot_dimension_numbers<[1], [0], [0], [1], [0, 0, 1, 1], [], []>} : vector<16x256xbf16>, vector<256x16xbf16>, vector<16x16xf32> -> vector<16x16xf32>
    %c0_15 = arith.constant 0 : index
    %c0_16 = arith.constant 0 : index
    %19 = vector.load %arg7[%c0_15, %c0_16] : memref<1x16xf32, #tpu.memory_space<vmem>>, vector<1x16xf32>
    %20 = vector.broadcast %19 : vector<1x16xf32> to vector<16x16xf32>
    %21 = arith.addf %18, %20 : vector<16x16xf32>
    %22 = tpu.iota {dimensions = array<i32: 1>} : vector<16x16xi32>
    %c8_i32 = arith.constant 8 : i32
    %23 = vector.broadcast %c8_i32 : i32 to vector<16x16xi32>
    %24 = arith.cmpi slt, %22, %23 : vector<16x16xi32>
    %25 = math.tanh %21 : vector<16x16xf32>
    %cst_17 = arith.constant -2.000000e+01 : f32
    %cst_18 = arith.constant 2.000000e+00 : f32
    %26 = vector.broadcast %cst_17 : f32 to vector<16x16xf32>
    %27 = arith.maximumf %26, %21 : vector<16x16xf32>
    %28 = vector.broadcast %cst_18 : f32 to vector<16x16xf32>
    %29 = arith.minimumf %28, %27 : vector<16x16xf32>
    %30 = arith.select %24, %25, %29 : vector<16x16xi1>, vector<16x16xf32>
    %c0_19 = arith.constant 0 : index
    %c0_20 = arith.constant 0 : index
    %31 = vector.load %arg8[%c0_19, %c0_20] : memref<16x16xf32, #tpu.memory_space<vmem>>, vector<16x16xf32>
    tpu.vector_store %arg8[%c0_19, %c0_20], %30 {strides = array<i32>} : memref<16x16xf32, #tpu.memory_space<vmem>>, vector<16x16xf32>,
    return
  }
  func.func @transform_0(%arg0: i32) -> (i32, i32) {
    %c0_i32 = arith.constant 0 : i32
    %c0_i32_0 = arith.constant 0 : i32
    return %arg0, %c0_i32 : i32, i32
  }
  func.func @transform_1(%arg0: i32) -> (i32, i32) {
    %c0_i32 = arith.constant 0 : i32
    %c0_i32_0 = arith.constant 0 : i32
    %c0_i32_1 = arith.constant 0 : i32
    return %c0_i32, %c0_i32_0 : i32, i32
  }
  func.func @transform_2(%arg0: i32) -> (i32, i32) {
    %c0_i32 = arith.constant 0 : i32
    %c0_i32_0 = arith.constant 0 : i32
    %c0_i32_1 = arith.constant 0 : i32
    return %c0_i32, %c0_i32_0 : i32, i32
  }
  func.func @transform_3(%arg0: i32) -> (i32, i32) {
    %c0_i32 = arith.constant 0 : i32
    %c0_i32_0 = arith.constant 0 : i32
    %c0_i32_1 = arith.constant 0 : i32
    return %c0_i32, %c0_i32_0 : i32, i32
  }
  func.func @transform_4(%arg0: i32) -> (i32, i32) {
    %c0_i32 = arith.constant 0 : i32
    %c0_i32_0 = arith.constant 0 : i32
    %c0_i32_1 = arith.constant 0 : i32
    return %c0_i32, %c0_i32_0 : i32, i32
  }
  func.func @transform_5(%arg0: i32) -> (i32, i32) {
    %c0_i32 = arith.constant 0 : i32
    %c0_i32_0 = arith.constant 0 : i32
    %c0_i32_1 = arith.constant 0 : i32
    return %c0_i32, %c0_i32_0 : i32, i32
  }
  func.func @transform_6(%arg0: i32) -> (i32, i32) {
    %c0_i32 = arith.constant 0 : i32
    %c0_i32_0 = arith.constant 0 : i32
    %c0_i32_1 = arith.constant 0 : i32
    return %c0_i32, %c0_i32_0 : i32, i32
  }
  func.func @transform_7(%arg0: i32) -> (i32, i32) {
    %c0_i32 = arith.constant 0 : i32
    %c0_i32_0 = arith.constant 0 : i32
    return %arg0, %c0_i32 : i32, i32
  }
}

</mosaic_0001>

<bundles_post_ra>
// kernel: ppo_actor_forward.1
= control target key start
LH: loop header
LB: loop body
LE: loop exit
PB: predicated region body
PF: predicated region fallthrough
CT: control target
= control target key end

     0   :  { %12 = vsyncpa [#allocation3], 0  ;;  %s763_s24 = smov [#allocation2]   ;;  %s890_s0 = inlined_call_operand.vmem [shape: bf16[16,32], index: 0, kind: input, shape index: {}]   ;;  %s891_s1 = inlined_call_operand.vmem [shape: bf16[32,256], index: 1, kind: input, shape index: {}]   ;;  %s892_s2 = inlined_call_operand.vmem [shape: f32[1,256], index: 2, kind: input, shape index: {}]   ;;  %s893_s3 = inlined_call_operand.hbm [shape: bf16[256,256], index: 3, kind: input, shape index: {}]   ;;  %s894_s4 = inlined_call_operand.vmem [shape: f32[1,256], index: 4, kind: input, shape index: {}]   ;;  %s895_s5 = inlined_call_operand.vmem [shape: bf16[256,16], index: 5, kind: input, shape index: {}]   ;;  %s896_s6 = inlined_call_operand.vmem [shape: f32[1,16], index: 6, kind: input, shape index: {}]   ;;  %s897_s7 = inlined_call_operand.vmem [shape: f32[16,16], index: 7, kind: output, shape index: {}]  }
   0x1   :  { %s24_s25 = sshll.u32 %s763_s24, 4  ;;  %s25_s25 = int_to_ptr.vmem [resolvable:$true] %s24_s25 }
   0x2   :  { %s749_s26 = scalar_lea.vmem %s25_s25, 4096  ;;  %p754_p1 = scmp.lt.s32.totalorder %s25_s25, %s25_s25 }
   0x3   :  { %p750_p0 = scmp.ne.s32.totalorder %s25_s25, %s749_s26  ;;  %p755_p2 = scmp.lt.s32.totalorder %s749_s26, %s749_s26 }
   0x5   :  { %p756_p3 = por %p755_p2, %p754_p1 }
   0x7   :  { %p757_p4 = pnand %p756_p3, %p750_p0 }
   0x9   :  { %760 = shalt.err (!%p757_p4)
}
   0xa   :  { %s764_s27 = smov 128   ;;  %s765_s28 = smov 8  }
   0xb   :  { %30 = dma.hbm_to_vmem [thread:$0]  %s893_s3, 4096, %s25_s25, [#allocation3], %s764_s27, %s764_s27, %s765_s28  }
   0xc   :  { %761 = dma.done.wait [#allocation3], 4096  }
   0xd   :  { %762 = vsyncadd [#allocation3], 4294963200  ;;  %v766_v0 = vmov 0   ;;  %v666_v1 = vld [vmem:[%s891_s1 + $0x14] ss:$8 sps:$4 sm:$0xff]   ;;  %v672_v8 = vld [vmem:[%s890_s0] sm:$0xff]   ;;  %v49_v48 = vlaneseq }
   0xe   :  { %120 = vmatprep.mubr.bf16.mxu0 %v766_v0  ;;  %v668_v2 = vld [vmem:[%s891_s1 + $0x10] ss:$8 sps:$4 sm:$0xff]   ;;  %100 = vmatprep.subr.bf16.mxu0 %v666_v1  ;;  %v669_v3 = vld [vmem:[%s891_s1 + $0x4] ss:$8 sps:$4 sm:$0xff]   ;;  %v671_v4 = vld [vmem:[%s891_s1] ss:$8 sps:$4 sm:$0xff]  }
   0xf   :  { %101 = vmatpush1.bf16.msra.mxu0 %v668_v2  ;;  %v673_v5 = vld [vmem:[#allocation2 + $0x74] ss:$8 sps:$4 sm:$0xff]   ;;  %v675_v6 = vld [vmem:[#allocation2 + $0x70] ss:$8 sps:$4 sm:$0xff]   ;;  %v676_v7 = vld [vmem:[#allocation2 + $0x64] ss:$8 sps:$4 sm:$0xff]  }
  0x10   :  { %102 = vmatprep.subr.bf16.mxu0 %v669_v3  ;;  %341 = vmatprep.subr.bf16.mxu1 %v673_v5  ;;  %vm84_vm0 = vcmask 261120   ;;  %v678_v9 = vld [vmem:[#allocation2 + $0x60] ss:$8 sps:$4 sm:$0xff]   ;;  %v679_v10 = vld [vmem:[#allocation2 + $0x54] ss:$8 sps:$4 sm:$0xff]   ;;  %v50_v49 = vshrl.u32 %v49_v48, 7 }
  0x11   :  { %342 = vmatpush1.bf16.msra.mxu1 %v675_v6  ;;  %v681_v11 = vld [vmem:[#allocation2 + $0x50] ss:$8 sps:$4 sm:$0xff]   ;;  %v682_v12 = vld [vmem:[#allocation2 + $0x44] ss:$8 sps:$4 sm:$0xff]   ;;  %v684_v13 = vld [vmem:[#allocation2 + $0x40] ss:$8 sps:$4 sm:$0xff]  }
  0x12   :  { %343 = vmatprep.subr.bf16.mxu1 %v676_v7  ;;  %v685_v14 = vld [vmem:[#allocation2 + $0x34] ss:$8 sps:$4 sm:$0xff]   ;;  %v687_v15 = vld [vmem:[#allocation2 + $0x30] ss:$8 sps:$4 sm:$0xff]   ;;  %v688_v16 = vld [vmem:[#allocation2 + $0x24] ss:$8 sps:$4 sm:$0xff]  }
  0x13   :  { %103 = vmatpush1.bf16.msra.mxu0 %v671_v4  ;;  %v690_v17 = vld [vmem:[#allocation2 + $0x20] ss:$8 sps:$4 sm:$0xff]   ;;  %v691_v18 = vld [vmem:[#allocation2 + $0x14] ss:$8 sps:$4 sm:$0xff]   ;;  %v693_v19 = vld [vmem:[#allocation2 + $0x10] ss:$8 sps:$4 sm:$0xff]  }
  0x14   :  { %v694_v20 = vld [vmem:[#allocation2 + $0x4] ss:$8 sps:$4 sm:$0xff]   ;;  %v696_v21 = vld [vmem:[#allocation2] ss:$8 sps:$4 sm:$0xff]   ;;  %v697_v22 = vld [vmem:[#allocation2 + $0xf4] ss:$8 sps:$4 sm:$0xff]  }
  0x15   :  { %344 = vmatpush1.bf16.msra.mxu1 %v678_v9  ;;  %v699_v23 = vld [vmem:[#allocation2 + $0xf0] ss:$8 sps:$4 sm:$0xff]   ;;  %v700_v24 = vld [vmem:[#allocation2 + $0xe4] ss:$8 sps:$4 sm:$0xff]   ;;  %v702_v25 = vld [vmem:[#allocation2 + $0xe0] ss:$8 sps:$4 sm:$0xff]  }
  0x16   :  { %590 = vmatmul.mubr.msk.bf16.vlgmr.msra.gmra.mxu0 %vm84_vm0, %v672_v8  ;;  %345 = vmatprep.subr.bf16.mxu1 %v679_v10  ;;  %v703_v26 = vld [vmem:[#allocation2 + $0xd4] ss:$8 sps:$4 sm:$0xff]   ;;  %v705_v27 = vld [vmem:[#allocation2 + $0xd0] ss:$8 sps:$4 sm:$0xff]   ;;  %v706_v28 = vld [vmem:[#allocation2 + $0xc4] ss:$8 sps:$4 sm:$0xff]  }
  0x17   :  { %v708_v29 = vld [vmem:[#allocation2 + $0xc0] ss:$8 sps:$4 sm:$0xff]   ;;  %v709_v30 = vld [vmem:[#allocation2 + $0xb4] ss:$8 sps:$4 sm:$0xff]   ;;  %v711_v31 = vld [vmem:[#allocation2 + $0xb0] ss:$8 sps:$4 sm:$0xff]  }
  0x18   :  { %v712_v32 = vld [vmem:[#allocation2 + $0xa4] ss:$8 sps:$4 sm:$0xff]   ;;  %v714_v33 = vld [vmem:[#allocation2 + $0xa0] ss:$8 sps:$4 sm:$0xff]   ;;  %v715_v34 = vld [vmem:[#allocation2 + $0x94] ss:$8 sps:$4 sm:$0xff]  }
  0x19   :  { %346 = vmatpush1.bf16.msra.mxu1 %v681_v11  ;;  %v717_v35 = vld [vmem:[#allocation2 + $0x90] ss:$8 sps:$4 sm:$0xff]   ;;  %v718_v36 = vld [vmem:[#allocation2 + $0x84] ss:$8 sps:$4 sm:$0xff]   ;;  %v720_v37 = vld [vmem:[#allocation2 + $0x80] ss:$8 sps:$4 sm:$0xff]  }
  0x1a   :  { %347 = vmatprep.subr.bf16.mxu1 %v682_v12  ;;  %v721_v38 = vld [vmem:[%s895_s5 + $0x78] sm:$0xff]   ;;  %v723_v40 = vld [vmem:[%s895_s5 + $0x70] sm:$0xff]   ;;  %v725_v42 = vld [vmem:[%s895_s5 + $0x68] sm:$0xff]   ;;  %v55_v50 = vsub.s32 1, %v50_v49  ;;  %v51_v51 = vsub.s32 0, %v50_v49  ;;  %vm577_vm2 = vcmask 130048  }
  0x1b   :  { %v722_v39 = vld [vmem:[%s895_s5 + $0x38] sm:$0xff]   ;;  %640 = vmatprep.subr.bf16.mxu0 %v721_v38  ;;  %v724_v41 = vld [vmem:[%s895_s5 + $0x30] sm:$0xff]   ;;  %v726_v43 = vld [vmem:[%s895_s5 + $0x28] sm:$0xff]  }
  0x1c   :  { %641 = vmatpush3.bf16.msra.mxu0 %v722_v39  ;;  %v727_v44 = vld [vmem:[%s895_s5 + $0x60] sm:$0xff]   ;;  %v729_v46 = vld [vmem:[%s895_s5 + $0x58] sm:$0xff]   ;;  %v731_v5 = vld [vmem:[%s895_s5 + $0x50] sm:$0xff]  }
  0x1d   :  { %348 = vmatpush1.bf16.msra.mxu1 %v684_v13  ;;  %642 = vmatprep.subr.bf16.mxu0 %v723_v40  ;;  %v728_v45 = vld [vmem:[%s895_s5 + $0x20] sm:$0xff]   ;;  %v730_v47 = vld [vmem:[%s895_s5 + $0x18] sm:$0xff]   ;;  %v732_v6 = vld [vmem:[%s895_s5 + $0x10] sm:$0xff]  }
  0x1e   :  { %349 = vmatprep.subr.bf16.mxu1 %v685_v14  ;;  %v47_v52 = vld [vmem:[%s892_s2] sm:$0x3]  ;;  %v733_v7 = vld [vmem:[%s895_s5 + $0x48] sm:$0xff]  }
  0x1f   :  { %v56_v54 = vrot.slane %v47_v52, %v55_v50  ;;  %v52_v55 = vrot.slane %v47_v52, %v51_v51  ;;  %v734_v8 = vld [vmem:[%s895_s5 + $0x8] sm:$0xff]   ;;  %v735_v9 = vld [vmem:[%s895_s5 + $0x40] sm:$0xff]  }
  0x20   :  { %643 = vmatpush3.bf16.msra.mxu0 %v724_v41  ;;  %v736_v10 = vld [vmem:[%s895_s5] sm:$0xff]  }
  0x21   :  { %350 = vmatpush1.bf16.msra.mxu1 %v687_v15  ;;  %644 = vmatprep.subr.bf16.mxu0 %v725_v42  ;;  %v169_v11 = vld [vmem:[%s894_s4] sm:$0x3] }
  0x22   :  { %351 = vmatprep.subr.bf16.mxu1 %v688_v16  ;;  %v178_v13 = vrot.slane %v169_v11, %v55_v50  ;;  %v174_v14 = vrot.slane %v169_v11, %v51_v51 }
  0x24   :  { %645 = vmatpush3.bf16.msra.mxu0 %v726_v43 }
  0x25   :  { %352 = vmatpush1.bf16.msra.mxu1 %v690_v17  ;;  %646 = vmatprep.subr.bf16.mxu0 %v727_v44 }
  0x26   :  { %353 = vmatprep.subr.bf16.mxu1 %v691_v18 }
  0x28   :  { %647 = vmatpush3.bf16.msra.mxu0 %v728_v45 }
  0x29   :  { %354 = vmatpush1.bf16.msra.mxu1 %v693_v19  ;;  %648 = vmatprep.subr.bf16.mxu0 %v729_v46 }
  0x2a   :  { %355 = vmatprep.subr.bf16.mxu1 %v694_v20 }
  0x2c   :  { %649 = vmatpush3.bf16.msra.mxu0 %v730_v47 }
  0x2d   :  { %356 = vmatpush1.bf16.msra.mxu1 %v696_v21  ;;  %650 = vmatprep.subr.bf16.mxu0 %v731_v5 }
  0x2e   :  { %357 = vmatprep.subr.bf16.mxu1 %v697_v22 }
  0x30   :  { %651 = vmatpush3.bf16.msra.mxu0 %v732_v6 }
  0x31   :  { %358 = vmatpush2.bf16.msra.mxu1 %v699_v23  ;;  %652 = vmatprep.subr.bf16.mxu0 %v733_v7 }
  0x32   :  { %359 = vmatprep.subr.bf16.mxu1 %v700_v24 }
  0x34   :  { %653 = vmatpush3.bf16.msra.mxu0 %v734_v8 }
  0x35   :  { %360 = vmatpush2.bf16.msra.mxu1 %v702_v25  ;;  %654 = vmatprep.subr.bf16.mxu0 %v735_v9 }
  0x36   :  { %361 = vmatprep.subr.bf16.mxu1 %v703_v26 }
  0x38   :  { %655 = vmatpush3.bf16.msra.mxu0 %v736_v10 }
  0x39   :  { %362 = vmatpush2.bf16.msra.mxu1 %v705_v27 }
  0x3a   :  { %363 = vmatprep.subr.bf16.mxu1 %v706_v28 }
  0x3d   :  { %364 = vmatpush2.bf16.msra.mxu1 %v708_v29  ;;  %v623_v29 = vld [vmem:[%s896_s6] ss:$0 sm:$0xff] }
  0x3e   :  { %365 = vmatprep.subr.bf16.mxu1 %v709_v30 }
  0x41   :  { %366 = vmatpush2.bf16.msra.mxu1 %v711_v31 }
  0x42   :  { %367 = vmatprep.subr.bf16.mxu1 %v712_v32 }
  0x45   :  { %368 = vmatpush2.bf16.msra.mxu1 %v714_v33 }
  0x46   :  { %369 = vmatprep.subr.bf16.mxu1 %v715_v34 }
  0x49   :  { %370 = vmatpush2.bf16.msra.mxu1 %v717_v35 }
  0x4a   :  { %371 = vmatprep.subr.bf16.mxu1 %v718_v36 }
  0x4d   :  { %372 = vmatpush2.bf16.msra.mxu1 %v720_v37  ;;  %v567_v37 = vand.u32 127, %v49_v48 }
  0x4f   :  { %vm568_vm1 = vcmp.lt.s32.totalorder %v567_v37, 8 }
  0xd6   :  { %v122_v53 = vpop.f32.mrf.mxu0 }
  0xd7   :  { %v123_v60 = vadd.f32 %v122_v53, %v52_v55 }
  0xd8   :  { %v124_v56 = vpop.f32.mrf.mxu0 }
  0xd9   :  { %v125_v58 = vadd.f32 %v124_v56, %v56_v54  ;;  %v131_v2 = vmax.f32 %v123_v60, 0.0 }
  0xda   :  { %v126_v57 = vpop.f32.mrf.mxu0 }
  0xdb   :  { %v127_v59 = vadd.f32 %v126_v57, %v52_v55  ;;  %v132_v0 = vmax.f32 %v125_v58, 0.0 }
  0xdc   :  { %v128_v61 = vpop.f32.mrf.mxu0 }
  0xdd   :  { %v129_v62 = vadd.f32 %v128_v61, %v56_v54  ;;  %v133_v63 = vmax.f32 %v127_v59, 0.0 }
  0xdf   :  { %v134_v1 = vmax.f32 %v129_v62, 0.0  ;;  %v135_v4 = vpack.c.bf16 %v133_v63, %v131_v2 }
  0xe1   :  { %v136_v3 = vpack.c.bf16 %v134_v1, %v132_v0 }
  0xe3   :  { %373 = vmatprep.mubr.bf16.mxu1 %v136_v3 }
  0xe4   :  { %374 = vmatmul.mubr.bf16.vlgmr.msra.gmra.mxu1 %v135_v4 }
 0x1a4   :  { %v375_v12 = vpop.f32.mrf.mxu1 }
 0x1a5   :  { %v376_v19 = vadd.f32 %v375_v12, %v174_v14 }
 0x1a6   :  { %v377_v15 = vpop.f32.mrf.mxu1 }
 0x1a7   :  { %v378_v17 = vadd.f32 %v377_v15, %v178_v13  ;;  %v384_v25 = vmax.f32 %v376_v19, 0.0 }
 0x1a8   :  { %v379_v16 = vpop.f32.mrf.mxu1 }
 0x1a9   :  { %v380_v18 = vadd.f32 %v379_v16, %v174_v14  ;;  %v385_v23 = vmax.f32 %v378_v17, 0.0 }
 0x1aa   :  { %v381_v20 = vpop.f32.mrf.mxu1 }
 0x1ab   :  { %v382_v21 = vadd.f32 %v381_v20, %v178_v13  ;;  %v386_v22 = vmax.f32 %v380_v18, 0.0 }
 0x1ad   :  { %v387_v24 = vmax.f32 %v382_v21, 0.0  ;;  %v388_v27 = vpack.c.bf16 %v386_v22, %v384_v25 }
 0x1af   :  { %v389_v26 = vpack.c.bf16 %v387_v24, %v385_v23 }
 0x1b1   :  { %557 = vmatprep.mubr.bf16.mxu0 %v389_v26 }
 0x1b2   :  { %558 = vmatmul.mubr.bf16.vlgmr.msra.gmra.mxu0 %v388_v27 }
 0x272   :  { %v656_v28 = vpop.f32.mrf.mxu0 }
 0x274   :  { %v657_v30 = vpop.f32.mrf.mxu0 }
 0x275   :  { %v658_v31 = vadd.f32 %v657_v30, %v656_v28 }
 0x276   :  { %v659_v32 = vpop.f32.mrf.mxu0 }
 0x277   :  { %v560_v33 = vadd.f32 %v658_v31, %v623_v29 }
 0x278   :  { %v660_v34 = vpop.f32.mrf.mxu0 }
 0x279   :  { %737 = vtanh.f32 %v560_v33  ;;  %v661_v35 = vadd.f32 %v660_v34, %v659_v32  ;;  %v571_v38 = vmax.f32 %v560_v33, -20.0 }
 0x27b   :  { %v563_v36 = vadd.f32 %v661_v35, %v623_v29  ;;  %v573_v39 = vmin.f32 %v571_v38, 2.0 }
 0x27d   :  { %739 = vtanh.f32 %v563_v36  ;;  %v572_v40 = vmax.f32 %v563_v36, -20.0 }
 0x27f   :  { %v574_v43 = vmin.f32 %v572_v40, 2.0 }
 0x286   :  { %v738_v41 = vpop.eup %737 }
 0x287   :  { %v575_v42 = vsel %vm568_vm1, %v738_v41, %v573_v39 }
 0x288   :  { %578 = vst.msk [vmem:[%s897_s7] sm:$0xff] %vm577_vm2, %v575_v42 }
 0x28a   :  { %v740_v44 = vpop.eup %739 }
 0x28b   :  { %v576_v45 = vsel %vm568_vm1, %v740_v44, %v574_v43 }
 0x28c   :  { %579 = vst.msk [vmem:[%s897_s7 + $0x8] sm:$0xff] %vm577_vm2, %v576_v45 }
 0x28d   :  { %584 = vsyncpa [#allocation3], 1 }

</bundles_post_ra>
